<compile_context>
chip_gen: v7x
topology: tpu7x:2x2x1
jax: 0.10.0
libtpu: 0.0.40
codegen_flags: <defaults>
</compile_context>

<pallas_src>
import functools

import numpy as np

import jax
import jax.numpy as jnp
from jax.experimental import pallas as pl
from jax.experimental.pallas import tpu as pltpu

HIDDEN = 64
HEADS = 4
NUM_CLASSES = 3
LN_EPS = 1e-5          # torch.nn.LayerNorm default
NEG_SLOPE = 0.2        # GATConv default negative_slope
NEG_BIG = -1e30        # "-inf" that stays NaN-free under subtraction


def _round_up(v, m):
    return (v + m - 1) // m * m


def _vmem_capacity():
    try:
        return int(pltpu.get_tpu_info().vmem_capacity_bytes)
    except Exception:
        return 64 * 2 ** 20      # conservative default (v7x per-core VMEM)


def _num_node_splits(n):
    # v7x has 2 TensorCores per chip; split the destination-node dimension there.
    try:
        kind = jax.devices()[0].device_kind.lower()
    except Exception:
        kind = ""
    return 2 if ("v7" in kind and n >= 2048) else 1


def _pick_edge_tile(e_tot, n_pad, n_half):
    # Largest edge tile whose double-buffered HBM slabs + in-kernel temps fit the
    # device's VMEM budget (64 MiB on v7x, 128 MiB on v5e/v6e); capped so small graphs
    # still exercise multi-tile accumulation. te must be a multiple of 128 (gdstT lanes).
    budget = int(_vmem_capacity() * 0.45)
    cap = max(128, _round_up(max(1, -(-e_tot // 2)), 128))
    hc_max = 2 * HIDDEN * HEADS
    for te in (2048, 1024, 512, 256, 128):
        if te > cap:
            continue
        stream = 2 * te * (2 * n_pad + 4 * n_half + 4 * HEADS)   # double-buffered slabs
        temps = te * hc_max * 14                                  # f32/bf16 tile temps
        if stream + temps <= budget:
            return te
    return 128


def _gat_vmem_limit(n_pad, n_half, fin, hc, cout, te):
    resident = (n_pad * (hc + HEADS) * 2 + n_pad * HEADS * 2 + n_pad * fin * 4
                + fin * hc * 2 + n_half * hc * 4 + 2 * n_half * HEADS * 4
                + n_half * cout * 4 + fin * cout * 2)
    stream = 2 * te * (2 * n_pad + 4 * n_half + 4 * HEADS)
    temps = (te * (hc + HEADS) * 4 + 2 * te * hc * 4 + te * hc * 2
             + 3 * n_half * hc * 4 + 8 * te * HEADS * 4)
    need = int((resident + stream + temps) * 1.5)
    cap = max(_vmem_capacity() - 2 * 2 ** 20, 32 * 2 ** 20)
    return int(min(max(need, 32 * 2 ** 20), cap))


# --------------------------------------------------------------------------------------
# Input projection: Linear + ReLU  (node-tiled, "parallel" => megacore-friendly)
# --------------------------------------------------------------------------------------
def _linear_relu_kernel(x_ref, w_ref, b_ref, o_ref):
    y = jnp.dot(x_ref[...].astype(jnp.bfloat16), w_ref[...],
                preferred_element_type=jnp.float32) + b_ref[...]
    o_ref[...] = jnp.maximum(y, 0.0)


def linear_relu(x, w, b):
    n, fin = x.shape
    fout = w.shape[1]
    tn = 512 if n >= 512 else _round_up(n, 8)
    n_pad = _round_up(n, tn)
    xin = x if n_pad == n else jnp.concatenate(
        [x, jnp.zeros((n_pad - n, fin), x.dtype)], axis=0)
    const = lambda i: (0, 0)
    out = pl.pallas_call(
        _linear_relu_kernel,
        out_shape=jax.ShapeDtypeStruct((n_pad, fout), jnp.float32),
        grid_spec=pltpu.PrefetchScalarGridSpec(
            num_scalar_prefetch=0, grid=(n_pad // tn,),
            in_specs=[pl.BlockSpec((tn, fin), lambda i: (i, 0)),
                      pl.BlockSpec((fin, fout), const),
                      pl.BlockSpec((1, fout), const)],
            out_specs=pl.BlockSpec((tn, fout), lambda i: (i, 0))),
        compiler_params=pltpu.CompilerParams(dimension_semantics=("parallel",)),
    )(xin, w.astype(jnp.bfloat16), b.reshape(1, -1))
    return out[:n]


# --------------------------------------------------------------------------------------
# Fused GAT block kernel:
#   out = ReLU( LayerNorm( GATConv(x) ) + (x @ Wp + bp  |  x) )
# Grid: (node_splits "parallel", edge_tiles "arbitrary").  Edges are destination-sorted
# and segmented per node split; online segment softmax with per-tile/per-head max merged
# into resident per-node (m, l, acc) state.  All gather/scatter matmuls bf16 on the MXU.
# --------------------------------------------------------------------------------------
def _gat_layer_kernel(x_ref, w_ref, asrc_ref, adst_ref, expand_ref, hmean_ref,
                      bg_ref, gamma_ref, beta_ref, wp_ref, bp_ref,
                      eb_ref, gsrc_ref, gdst_ref, gdstT_ref,
                      o_ref,
                      tab_sc, adst_sc, m_sc, l_sc, acc_sc,
                      *, hc, n_half, has_proj):
    half = pl.program_id(0)
    t = pl.program_id(1)
    T = pl.num_programs(1)
    row0 = pl.multiple_of(half * n_half, 8)

    # ---- one-time prologue per node split: project nodes, cache tables, residual ----
    @pl.when(t == 0)
    def _init():
        xb = x_ref[...].astype(jnp.bfloat16)
        xp = jnp.dot(xb, w_ref[...], preferred_element_type=jnp.float32)     # [N, HC]
        xpb = xp.astype(jnp.bfloat16)
        tab_sc[:, :hc] = xpb                                                 # x' (bf16)
        tab_sc[:, hc:] = jnp.dot(xpb, asrc_ref[...],                         # a_src cols
                                 preferred_element_type=jnp.float32).astype(jnp.bfloat16)
        adst_sc[...] = jnp.dot(xpb, adst_ref[...],
                               preferred_element_type=jnp.float32).astype(jnp.bfloat16)
        m_sc[...] = jnp.full_like(m_sc, NEG_BIG)
        l_sc[...] = jnp.zeros_like(l_sc)
        acc_sc[...] = jnp.zeros_like(acc_sc)
        if has_proj:
            # residual projection hoisted out of the epilogue; resident in o_ref
            xh = x_ref[pl.ds(row0, n_half), :].astype(jnp.bfloat16)
            o_ref[...] = jnp.dot(xh, wp_ref[...],
                                 preferred_element_type=jnp.float32) + bp_ref[...]

    # ---- per edge-tile: logits -> per-tile max -> exp -> scatter -> online merge ----
    ge = jnp.dot(gsrc_ref[...], tab_sc[...], preferred_element_type=jnp.float32)
    xp_e = ge[:, :hc]                                                        # [te, HC]
    a_src = ge[:, hc:]                                                       # [te, H]
    a_dst = jnp.dot(gdst_ref[...], adst_sc[pl.ds(row0, n_half), :],
                    preferred_element_type=jnp.float32)                      # [te, H]
    alpha = a_src + a_dst + eb_ref[...]
    alpha = jnp.where(alpha > 0, alpha, NEG_SLOPE * alpha)                   # LeakyReLU

    c_tile = jnp.max(alpha, axis=0, keepdims=True)                           # [1, H]
    q = jnp.exp(alpha - c_tile)                                              # [te, H]
    q_full = jnp.dot(q, expand_ref[...], preferred_element_type=jnp.float32)  # [te, HC]
    msg = (q_full * xp_e).astype(jnp.bfloat16)

    gdT = gdstT_ref[...]                                                     # [Nh, te] bf16
    v = jnp.dot(gdT, msg, preferred_element_type=jnp.float32)                # [Nh, HC]
    s = jnp.dot(gdT, q.astype(jnp.bfloat16), preferred_element_type=jnp.float32)

    m_new = jnp.maximum(m_sc[...], c_tile)
    corr = jnp.exp(m_sc[...] - m_new)
    bet = jnp.exp(c_tile - m_new)
    corr_f = jnp.dot(corr, expand_ref[...], preferred_element_type=jnp.float32)
    bet_f = jnp.dot(bet, expand_ref[...], preferred_element_type=jnp.float32)
    l_sc[...] = corr * l_sc[...] + bet * s
    acc_sc[...] = corr_f * acc_sc[...] + bet_f * v
    m_sc[...] = m_new

    # ---- finalize: normalize, head-mean + bias, LayerNorm, residual, ReLU ----
    @pl.when(t == T - 1)
    def _fin():
        inv = 1.0 / jnp.maximum(l_sc[...], 1e-20)      # exact divide (parity with torch)
        inv_f = jnp.dot(inv, expand_ref[...], preferred_element_type=jnp.float32)
        per_head = (acc_sc[...] * inv_f).astype(jnp.bfloat16)
        gat = jnp.dot(per_head, hmean_ref[...],
                      preferred_element_type=jnp.float32) + bg_ref[...]      # [Nh, Cout]
        mu = jnp.mean(gat, axis=1, keepdims=True)
        var = jnp.mean((gat - mu) ** 2, axis=1, keepdims=True)
        y = (gat - mu) * jax.lax.rsqrt(var + LN_EPS) * gamma_ref[...] + beta_ref[...]
        if has_proj:
            identity = o_ref[...]
        else:
            identity = x_ref[pl.ds(row0, n_half), :]
        o_ref[...] = jnp.maximum(y + identity, 0.0)


def gat_fused_layer(x, gp, wp, bp, gamma, beta_ln, g, heads=HEADS):
    n_pad, fin = x.shape
    hc = gp['w'].shape[1]
    c = hc // heads
    cout = c                      # concat=False -> mean over heads
    te = g['e_tile']
    t_max = g['t_max']
    splits = g['num_splits']
    n_half = g['n_half']
    has_proj = wp is not None

    eye_h = jnp.eye(heads, dtype=jnp.float32)
    asrc_sel = (gp['asrc'].reshape(heads, c)[:, :, None] * eye_h[:, None, :]
                ).reshape(hc, heads).astype(jnp.bfloat16)
    adst_sel = (gp['adst'].reshape(heads, c)[:, :, None] * eye_h[:, None, :]
                ).reshape(hc, heads).astype(jnp.bfloat16)
    expand = (eye_h[:, :, None] * jnp.ones((1, 1, c), jnp.float32)).reshape(heads, hc)
    hmean = (jnp.tile(jnp.eye(c, dtype=jnp.float32), (heads, 1)) / float(heads)
             ).astype(jnp.bfloat16)
    s_head = (gp['aedge'] * gp['we']).reshape(heads, c).sum(axis=1)          # [H]
    eb = g['ea'].reshape(-1, 1) * s_head.reshape(1, heads)                   # [E_pad, H]

    if has_proj:
        wp_in = wp.astype(jnp.bfloat16)
        bp_in = bp.reshape(1, -1).astype(jnp.float32)
    else:
        wp_in = jnp.zeros((1, 1), jnp.bfloat16)
        bp_in = jnp.zeros((1, 1), jnp.float32)

    idx_e = lambda s, t: (s * t_max + t, 0)
    idx_eT = lambda s, t: (0, s * t_max + t)
    const = lambda s, t: (0, 0)

    grid_spec = pltpu.PrefetchScalarGridSpec(
        num_scalar_prefetch=0,
        grid=(splits, t_max),
        in_specs=[
            pl.BlockSpec((n_pad, fin), const),           # x (resident)
            pl.BlockSpec((fin, hc), const),              # W (bf16)
            pl.BlockSpec((hc, heads), const),            # att_src selector
            pl.BlockSpec((hc, heads), const),            # att_dst selector
            pl.BlockSpec((heads, hc), const),            # head-expand selector
            pl.BlockSpec((hc, cout), const),             # head-mean selector
            pl.BlockSpec((1, cout), const),              # GAT bias
            pl.BlockSpec((1, cout), const),              # LN gamma
            pl.BlockSpec((1, cout), const),              # LN beta
            pl.BlockSpec(wp_in.shape, const),            # residual proj W (or dummy)
            pl.BlockSpec(bp_in.shape, const),            # residual proj b (or dummy)
            pl.BlockSpec((te, heads), idx_e),            # per-edge logit bias (precomp.)
            pl.BlockSpec((te, n_pad), idx_e),            # one-hot(src)          bf16
            pl.BlockSpec((te, n_half), idx_e),           # one-hot(local dst)    bf16
            pl.BlockSpec((n_half, te), idx_eT),          # one-hot(local dst)^T  bf16
        ],
        out_specs=pl.BlockSpec((n_half, cout), lambda s, t: (s, 0)),
        scratch_shapes=[
            pltpu.VMEM((n_pad, hc + heads), jnp.bfloat16),   # [x'W | a_src] gather table
            pltpu.VMEM((n_pad, heads), jnp.bfloat16),        # per-node dst logits
            pltpu.VMEM((n_half, heads), jnp.float32),        # running max
            pltpu.VMEM((n_half, heads), jnp.float32),        # running denominator
            pltpu.VMEM((n_half, hc), jnp.float32),           # running weighted messages
        ])

    kern = functools.partial(_gat_layer_kernel, hc=hc, n_half=n_half, has_proj=has_proj)
    return pl.pallas_call(
        kern,
        out_shape=jax.ShapeDtypeStruct((n_pad, cout), jnp.float32),
        grid_spec=grid_spec,
        compiler_params=pltpu.CompilerParams(
            dimension_semantics=("parallel", "arbitrary"),
            vmem_limit_bytes=_gat_vmem_limit(n_pad, n_half, fin, hc, cout, te)),
    )(x, gp['w'].astype(jnp.bfloat16), asrc_sel, adst_sel, expand, hmean,
      gp['b'].reshape(1, -1), gamma.reshape(1, -1), beta_ln.reshape(1, -1),
      wp_in, bp_in, eb, g['gsrc'], g['gdst'], g['gdst_t'])


# --------------------------------------------------------------------------------------
# Fused classifier head: Linear->LN->ReLU->Linear->LN->ReLU->Linear->log_softmax
# Node-tiled "parallel" grid; output padded to 128 lanes (sliced outside).
# --------------------------------------------------------------------------------------
def _mlp_head_kernel(x_ref, w1_ref, b1_ref, g1_ref, be1_ref,
                     w2_ref, b2_ref, g2_ref, be2_ref,
                     w3_ref, b3_ref, o_ref, *, num_classes):
    def ln(v, gm, bt):
        mu = jnp.mean(v, axis=1, keepdims=True)
        var = jnp.mean((v - mu) ** 2, axis=1, keepdims=True)
        return (v - mu) * jax.lax.rsqrt(var + LN_EPS) * gm + bt

    h = jnp.dot(x_ref[...].astype(jnp.bfloat16), w1_ref[...],
                preferred_element_type=jnp.float32) + b1_ref[...]
    h = jnp.maximum(ln(h, g1_ref[...], be1_ref[...]), 0.0)
    h = jnp.dot(h.astype(jnp.bfloat16), w2_ref[...],
                preferred_element_type=jnp.float32) + b2_ref[...]
    h = jnp.maximum(ln(h, g2_ref[...], be2_ref[...]), 0.0)
    y = jnp.dot(h.astype(jnp.bfloat16), w3_ref[...],
                preferred_element_type=jnp.float32) + b3_ref[...]   # [tn, 128] padded

    col = jax.lax.broadcasted_iota(jnp.int32, y.shape, 1)
    valid = col < num_classes
    yv = jnp.where(valid, y, jnp.float32(NEG_BIG))
    m = jnp.max(yv, axis=1, keepdims=True)
    z = yv - m
    lse = jnp.log(jnp.sum(jnp.exp(z), axis=1, keepdims=True))
    o_ref[...] = jnp.where(valid, z - lse, 0.0)


def classifier_head(x, p, num_classes=NUM_CLASSES, pad_classes=128):
    n, fin = x.shape
    h2 = p['cls1']['w'].shape[1]
    h3 = p['cls2']['w'].shape[1]
    tn = 512 if n >= 512 else _round_up(n, 8)
    n_pad = _round_up(n, tn)
    xin = x if n_pad == n else jnp.concatenate(
        [x, jnp.zeros((n_pad - n, fin), x.dtype)], axis=0)

    w3 = jnp.zeros((h3, pad_classes), jnp.float32).at[:, :num_classes].set(p['cls3']['w'])
    b3 = jnp.zeros((pad_classes,), jnp.float32).at[:num_classes].set(p['cls3']['b'])

    const = lambda i: (0, 0)
    out = pl.pallas_call(
        functools.partial(_mlp_head_kernel, num_classes=num_classes),
        out_shape=jax.ShapeDtypeStruct((n_pad, pad_classes), jnp.float32),
        grid_spec=pltpu.PrefetchScalarGridSpec(
            num_scalar_prefetch=0,
            grid=(n_pad // tn,),
            in_specs=[
                pl.BlockSpec((tn, fin), lambda i: (i, 0)),
                pl.BlockSpec((fin, h2), const), pl.BlockSpec((1, h2), const),
                pl.BlockSpec((1, h2), const), pl.BlockSpec((1, h2), const),
                pl.BlockSpec((h2, h3), const), pl.BlockSpec((1, h3), const),
                pl.BlockSpec((1, h3), const), pl.BlockSpec((1, h3), const),
                pl.BlockSpec((h3, pad_classes), const), pl.BlockSpec((1, pad_classes), const),
            ],
            out_specs=pl.BlockSpec((tn, pad_classes), lambda i: (i, 0))),
        compiler_params=pltpu.CompilerParams(dimension_semantics=("parallel",)),
    )(xin,
      p['cls1']['w'].astype(jnp.bfloat16), p['cls1']['b'].reshape(1, -1),
      p['cls_ln1']['g'].reshape(1, -1), p['cls_ln1']['b'].reshape(1, -1),
      p['cls2']['w'].astype(jnp.bfloat16), p['cls2']['b'].reshape(1, -1),
      p['cls_ln2']['g'].reshape(1, -1), p['cls_ln2']['b'].reshape(1, -1),
      w3.astype(jnp.bfloat16), b3.reshape(1, -1))
    return out[:n, :num_classes]


# --------------------------------------------------------------------------------------
# Host-side graph preprocessing: self-loops (fill_value='mean'), destination-sorted edge
# list segmented per node split, padded to whole edge tiles; bf16 one-hot operands with
# the scatter operand pre-transposed in HBM.
# --------------------------------------------------------------------------------------
def build_graph(edge_index, edge_attr, num_nodes, n_pad, num_splits, e_tile):
    ei = np.asarray(jax.device_get(edge_index))
    src = ei[0].astype(np.int64)
    dst = ei[1].astype(np.int64)
    ea = np.asarray(jax.device_get(edge_attr)).astype(np.float32).reshape(-1)

    loop = np.arange(num_nodes, dtype=np.int64)
    mean_attr = float(ea.mean()) if ea.size else 0.0
    src = np.concatenate([src, loop])
    dst = np.concatenate([dst, loop])
    ea = np.concatenate([ea, np.full((num_nodes,), mean_attr, np.float32)])

    order = np.argsort(dst, kind="stable")        # destination-sorted (item-1 groundwork)
    src, dst, ea = src[order], dst[order], ea[order]

    n_half = n_pad // num_splits
    half = dst // n_half
    counts = np.bincount(half, minlength=num_splits)
    t_max = max(1, int(np.ceil(counts.max() / e_tile)))
    e_layout = num_splits * t_max * e_tile

    src_l = np.full((e_layout,), -1, np.int32)    # -1 -> all-zero one-hot row (padding)
    dst_l = np.full((e_layout,), -1, np.int32)
    ea_l = np.zeros((e_layout,), np.float32)
    off = 0
    for h in range(num_splits):
        cnt = int(counts[h])
        base = h * t_max * e_tile
        src_l[base:base + cnt] = src[off:off + cnt]
        dst_l[base:base + cnt] = dst[off:off + cnt] - h * n_half
        ea_l[base:base + cnt] = ea[off:off + cnt]
        off += cnt

    gsrc = jax.nn.one_hot(jnp.asarray(src_l), n_pad, dtype=jnp.bfloat16)     # [E, n_pad]
    gdst = jax.nn.one_hot(jnp.asarray(dst_l), n_half, dtype=jnp.bfloat16)    # [E, n_half]
    gdst_t = jnp.transpose(gdst)                                             # [n_half, E]
    return dict(ea=jnp.asarray(ea_l), gsrc=gsrc, gdst=gdst, gdst_t=gdst_t,
                t_max=t_max, e_tile=e_tile, num_splits=num_splits,
                n_half=n_half, n_pad=n_pad)


# --------------------------------------------------------------------------------------
# Parameter init (deterministic, synthetic; layout self-consistent with the kernels)
# --------------------------------------------------------------------------------------
def _lin_init(key, fin, fout):
    kw, kb = jax.random.split(key)
    return {'w': jax.random.normal(kw, (fin, fout), jnp.float32) / jnp.sqrt(float(fin)),
            'b': jax.random.normal(kb, (fout,), jnp.float32) * 0.01}


def _gat_init(key, fin, fout, heads):
    ks = jax.random.split(key, 5)
    hc = heads * fout
    return {'w': jax.random.normal(ks[0], (fin, hc), jnp.float32) / jnp.sqrt(float(fin)),
            'we': jax.random.normal(ks[1], (1, hc), jnp.float32),
            'asrc': jax.random.normal(ks[2], (1, hc), jnp.float32) / jnp.sqrt(float(fout)),
            'adst': jax.random.normal(ks[3], (1, hc), jnp.float32) / jnp.sqrt(float(fout)),
            'aedge': jax.random.normal(ks[4], (1, hc), jnp.float32) / jnp.sqrt(float(fout)),
            'b': jnp.zeros((fout,), jnp.float32)}


def _ln_init(dim):
    return {'g': jnp.ones((dim,), jnp.float32), 'b': jnp.zeros((dim,), jnp.float32)}


def init_params(key, num_node_features, hidden=HIDDEN, num_classes=NUM_CLASSES, heads=HEADS):
    ks = jax.random.split(key, 10)
    return {
        'input_proj': _lin_init(ks[0], num_node_features, hidden),
        'conv1': _gat_init(ks[1], hidden, hidden, heads),
        'norm1': _ln_init(hidden),
        'conv2': _gat_init(ks[2], hidden, hidden * 2, heads),
        'norm2': _ln_init(hidden * 2),
        'proj2': _lin_init(ks[3], hidden, hidden * 2),
        'conv3': _gat_init(ks[4], hidden * 2, hidden * 2, heads),
        'norm3': _ln_init(hidden * 2),
        'conv4': _gat_init(ks[5], hidden * 2, hidden, heads),
        'norm4': _ln_init(hidden),
        'proj4': _lin_init(ks[6], hidden * 2, hidden),
        'cls1': _lin_init(ks[7], hidden, hidden * 2),
        'cls_ln1': _ln_init(hidden * 2),
        'cls2': _lin_init(ks[8], hidden * 2, hidden),
        'cls_ln2': _ln_init(hidden),
        'cls3': _lin_init(ks[9], hidden, num_classes),
    }


# --------------------------------------------------------------------------------------
# Forward pass (dropout = identity in inference mode)
# --------------------------------------------------------------------------------------
def forward(params, x, edge_index, edge_attr, num_splits=None):
    n_real, f_in = x.shape
    if num_splits is None:
        num_splits = _num_node_splits(n_real)
    n_pad = _round_up(max(n_real, 8), 8 * num_splits)
    n_half = n_pad // num_splits
    e_tot = int(edge_index.shape[1]) + n_real
    e_tile = _pick_edge_tile(e_tot, n_pad, n_half)
    g = build_graph(edge_index, edge_attr, n_real, n_pad, num_splits, e_tile)

    xin = jnp.zeros((n_pad, f_in), jnp.float32).at[:n_real].set(x.astype(jnp.float32))
    p = params

    h = linear_relu(xin, p['input_proj']['w'], p['input_proj']['b'])
    # block 1: GATConv(64->64) + LN + residual(x) + ReLU   (identity residual: no matmul)
    h = gat_fused_layer(h, p['conv1'], None, None, p['norm1']['g'], p['norm1']['b'], g)
    # block 2: GATConv(64->128) + LN + residual(proj2(x)) + ReLU
    h = gat_fused_layer(h, p['conv2'], p['proj2']['w'], p['proj2']['b'],
                        p['norm2']['g'], p['norm2']['b'], g)
    # block 3: GATConv(128->128) + LN + residual(x) + ReLU
    h = gat_fused_layer(h, p['conv3'], None, None, p['norm3']['g'], p['norm3']['b'], g)
    # block 4: GATConv(128->64) + LN + residual(proj4(x)) + ReLU
    h = gat_fused_layer(h, p['conv4'], p['proj4']['w'], p['proj4']['b'],
                        p['norm4']['g'], p['norm4']['b'], g)

    out = classifier_head(h, p)
    return out[:n_real]


if __name__ == "__main__":
    key = jax.random.PRNGKey(0)
    N, F, E = 32, 8, 220
    k1, k2, k3, k4 = jax.random.split(key, 4)

    x = jax.random.normal(k1, (N, F), jnp.float32)
    src = jax.random.randint(k2, (E,), 0, N)
    # generated edges are never self-loops (GATConv adds self-loops itself)
    dst = (src + 1 + jax.random.randint(k3, (E,), 0, N - 1)) % N
    edge_index = jnp.stack([src, dst]).astype(jnp.int32)        # [2, E]
    edge_attr = jax.random.uniform(k4, (E, 1), jnp.float32)     # [E, 1]

    params = init_params(jax.random.PRNGKey(42), F)

    out = jax.block_until_ready(forward(params, x, edge_index, edge_attr))
    assert out.shape == (N, NUM_CLASSES)
    assert bool(jnp.all(jnp.isfinite(out)))

    # also exercise + validate the 2-way destination-node-split (megacore) path
    out2 = jax.block_until_ready(forward(params, x, edge_index, edge_attr, num_splits=2))
    assert out2.shape == (N, NUM_CLASSES)
    assert bool(jnp.all(jnp.isfinite(out2)))
    assert float(jnp.max(jnp.abs(out - out2))) < 0.25

    print("KERNEL_OK")
</pallas_src>

<mosaic_0001>
module attributes {stable_mosaic.version = 11 : i64} {
  func.func @_linear_relu_kernel(%arg0: i32, %arg1: memref<32x8xf32, #tpu.memory_space<vmem>>, %arg2: memref<8x64xbf16, #tpu.memory_space<vmem>>, %arg3: memref<1x64xf32, #tpu.memory_space<vmem>>, %arg4: memref<32x64xf32, #tpu.memory_space<vmem>>) attributes {dimension_semantics = [#tpu.dimension_semantics<parallel>], iteration_bounds = array<i64: 1>, scalar_prefetch = 0 : i64, scratch_operands = 0 : i64, tpu.core_type = #tpu.core_type<tc>, window_params = [{transform_indices = @transform_0, window_bounds = array<i64: 32, 8>}, {pipeline_mode = #tpu.pipeline_mode<synchronous>, transform_indices = @transform_1, window_bounds = array<i64: 8, 64>}, {pipeline_mode = #tpu.pipeline_mode<synchronous>, transform_indices = @transform_2, window_bounds = array<i64: 1, 64>}, {transform_indices = @transform_3, window_bounds = array<i64: 32, 64>}]} {
    %c0 = arith.constant 0 : index
    %c0_0 = arith.constant 0 : index
    %0 = vector.load %arg1[%c0, %c0_0] : memref<32x8xf32, #tpu.memory_space<vmem>>, vector<32x8xf32>
    %1 = arith.truncf %0 : vector<32x8xf32> to vector<32x8xbf16>
    %c0_1 = arith.constant 0 : index
    %c0_2 = arith.constant 0 : index
    %2 = vector.load %arg2[%c0_1, %c0_2] : memref<8x64xbf16, #tpu.memory_space<vmem>>, vector<8x64xbf16>
    %cst = arith.constant dense<0.000000e+00> : vector<32x64xf32>
    %3 = tpu.matmul %1, %2, %cst {dimension_numbers = #tpu.dot_dimension_numbers<[1], [0], [0], [1], [0, 0, 1, 1], [], []>} : vector<32x8xbf16>, vector<8x64xbf16>, vector<32x64xf32> -> vector<32x64xf32>
    %c0_3 = arith.constant 0 : index
    %c0_4 = arith.constant 0 : index
    %4 = vector.load %arg3[%c0_3, %c0_4] : memref<1x64xf32, #tpu.memory_space<vmem>>, vector<1x64xf32>
    %5 = vector.broadcast %4 : vector<1x64xf32> to vector<32x64xf32>
    %6 = arith.addf %3, %5 : vector<32x64xf32>
    %cst_5 = arith.constant 0.000000e+00 : f32
    %7 = vector.broadcast %cst_5 : f32 to vector<32x64xf32>
    %8 = arith.maximumf %6, %7 : vector<32x64xf32>
    %c0_6 = arith.constant 0 : index
    %c0_7 = arith.constant 0 : index
    %9 = vector.load %arg4[%c0_6, %c0_7] : memref<32x64xf32, #tpu.memory_space<vmem>>, vector<32x64xf32>
    tpu.vector_store %arg4[%c0_6, %c0_7], %8 {strides = array<i32>} : memref<32x64xf32, #tpu.memory_space<vmem>>, vector<32x64xf32>,
    return
  }
  func.func @transform_0(%arg0: i32) -> (i32, i32) {
    %c0_i32 = arith.constant 0 : i32
    %c0_i32_0 = arith.constant 0 : i32
    return %arg0, %c0_i32 : i32, i32
  }
  func.func @transform_1(%arg0: i32) -> (i32, i32) {
    %c0_i32 = arith.constant 0 : i32
    %c0_i32_0 = arith.constant 0 : i32
    %c0_i32_1 = arith.constant 0 : i32
    return %c0_i32, %c0_i32_0 : i32, i32
  }
  func.func @transform_2(%arg0: i32) -> (i32, i32) {
    %c0_i32 = arith.constant 0 : i32
    %c0_i32_0 = arith.constant 0 : i32
    %c0_i32_1 = arith.constant 0 : i32
    return %c0_i32, %c0_i32_0 : i32, i32
  }
  func.func @transform_3(%arg0: i32) -> (i32, i32) {
    %c0_i32 = arith.constant 0 : i32
    %c0_i32_0 = arith.constant 0 : i32
    return %arg0, %c0_i32 : i32, i32
  }
}

</mosaic_0001>

<bundles_post_ra>
// kernel: tpu_custom_call.1
= control target key start
LH: loop header
LB: loop body
LE: loop exit
PB: predicated region body
PF: predicated region fallthrough
CT: control target
= control target key end

     0   :  { %vm37_vm0 = vcmask 1043456   ;;  %vm30_vm1 = vcmask 64512   ;;  %s212_s0 = inlined_call_operand.vmem [shape: f32[32,8], index: 0, kind: input, shape index: {}]   ;;  %s213_s1 = inlined_call_operand.vmem [shape: bf16[8,64], index: 1, kind: input, shape index: {}]   ;;  %s214_s2 = inlined_call_operand.vmem [shape: f32[1,64], index: 2, kind: input, shape index: {}]   ;;  %s215_s3 = inlined_call_operand.hbm [shape: f32[32,64], index: 3, kind: output, shape index: {}]  }
   0x1   :  { %v22_v0 = vld [vmem:[%s213_s1] sm:$0xf]  ;;  %v17_v2 = vld [vmem:[%s212_s0 + $0x8] sm:$0xff]  ;;  %v18_v5 = vld [vmem:[%s212_s0 + $0x10] sm:$0xff] }
   0x2   :  { %v16_v1 = vld [vmem:[%s212_s0] sm:$0xff]  ;;  %127 = vmatprep.subr.msk.bf16.mxu0 %vm37_vm0, %v22_v0  ;;  %v39_v3 = vsel %vm37_vm0, %v22_v0, 0  ;;  %v19_v6 = vld [vmem:[%s212_s0 + $0x18] sm:$0xff] }
   0x3   :  { %v20_v4 = vpack.c.bf16 %v17_v2, %v16_v1 }
   0x4   :  { %8 = vsyncpa [#allocation3], 0  ;;  %122 = vmatpush3.bf16.msra.mxu0 %v39_v3  ;;  %v21_v7 = vpack.c.bf16 %v19_v6, %v18_v5  ;;  %v115_v8 = vld [vmem:[%s214_s2] ss:$0 sm:$0xff]  ;;  %vm94_vm2 = vcmask 523264   ;;  %s155_s23 = smov [#allocation2]  }
   0x5   :  { %123 = vmatprep.mubr.msk.bf16.mxu0 %vm30_vm1, %v20_v4  ;;  %s104_s24 = sshll.u32 %s155_s23, 4  ;;  %s105_s24 = int_to_ptr.vmem [resolvable:$true] %s104_s24 }
   0x6   :  { %s131_s0 = scalar_lea.vmem %s105_s24, 512  ;;  %p136_p1 = scmp.lt.s32.totalorder %s105_s24, %s105_s24 }
   0x7   :  { %124 = vmatmul.mubr.msk.bf16.vlgmr.msra.gmra.mrb[0].mxu0 %vm30_vm1, %v21_v7  ;;  %p132_p0 = scmp.ne.s32.totalorder %s105_s24, %s131_s0  ;;  %p137_p2 = scmp.lt.s32.totalorder %s131_s0, %s131_s0 }
   0x9   :  { %p138_p3 = por %p137_p2, %p136_p1 }
   0xb   :  { %p139_p4 = pnand %p138_p3, %p132_p0 }
  0xda   :  { %v125_v9 = vpop.f32.mrb[0].mxu0 }
  0xdb   :  { %v84_v10 = vadd.f32 %v125_v9, %v115_v8  ;;  %v75_v11 = vpop.f32.mrb[1].mxu0 }
  0xdc   :  { %v76_v12 = vadd.f32 %v115_v8, %v75_v11  ;;  %v126_v13 = vpop.f32.mrb[2].mxu0 }
  0xdd   :  { %v92_v14 = vmax.f32 %v84_v10, 0.0  ;;  %v87_v15 = vadd.f32 %v126_v13, %v115_v8  ;;  %v78_v16 = vpop.f32.mrb[3].mxu0 }
  0xde   :  { %v90_v17 = vmax.f32 %v76_v12, 0.0  ;;  %v79_v18 = vadd.f32 %v115_v8, %v78_v16 }
  0xdf   :  { %97 = vst.msk [vmem:[#allocation2 + $0x10] sm:$0xff] %vm94_vm2, %v92_v14  ;;  %v93_v19 = vmax.f32 %v87_v15, 0.0 }
  0xe0   :  { %95 = vst.msk [vmem:[#allocation2] sm:$0xff] %vm94_vm2, %v90_v17  ;;  %v91_v20 = vmax.f32 %v79_v18, 0.0 }
  0xe1   :  { %98 = vst.msk [vmem:[#allocation2 + $0x18] sm:$0xff] %vm94_vm2, %v93_v19 }
  0xe2   :  { %96 = vst.msk [vmem:[#allocation2 + $0x8] sm:$0xff] %vm94_vm2, %v91_v20 }
  0xe3   :  { %142 = shalt.err (!%p139_p4)
}
  0xe4   :  { %s143_s26 = scalar_lea.hbm %s215_s3, 512 }
  0xe5   :  { %p144_p5 = scmp.ne.s32.totalorder %s215_s3, %s143_s26  ;;  %p147_p6 = scmp.lt.u32.totalorder %s143_s26, %s215_s3 }
  0xe7   :  { %p149_p7 = pnand %p147_p6, %p144_p5 }
  0xe9   :  { %152 = shalt.err (!%p149_p7)
}
  0xea   :  { %s156_s4 = smov 128   ;;  %s157_s5 = smov 8  }
  0xeb   :  { %110 = dma.vmem_to_hbm [thread:$0]  %s105_s24, 512, %s215_s3, [#allocation3], %s156_s4, %s156_s4, %s157_s5  }
  0xec   :  { %153 = dma.done.wait [#allocation3], 512  }
  0xed   :  { %154 = vsyncadd [#allocation3], 4294966784 }
  0xee   :  { %114 = vsyncpa [#allocation3], 1 }

</bundles_post_ra>
